<compile_context>
chip_gen: v7x
topology: tpu7x:2x2x1
jax: 0.10.0
libtpu: 0.0.40
codegen_flags: <defaults>
</compile_context>

<pallas_src>
import jax
import jax.numpy as jnp
from jax.experimental import pallas as pl
from jax.experimental.pallas import tpu as pltpu

_LANE_COLS = 1024        # 8 sublanes * 128 lanes -> lane-dense slab width
_MAX_BLOCK_ROWS = 256    # (256, 1024) f32 tile = 1 MiB; x(in+out) x2 buffers ~ 4 MiB VMEM
_SQRT2 = 1.4142135623730951


def _hash_u32(x):
    """lowbias32 integer hash: good avalanche for sequential counter inputs."""
    x = x ^ (x >> 16)
    x = x * jnp.uint32(0x7FEB352D)
    x = x ^ (x >> 15)
    x = x * jnp.uint32(0x846CA68B)
    x = x ^ (x >> 16)
    return x


def _erfinv(x):
    """Giles single-precision polynomial approximation of erfinv(x), |x| < 1.

    Uses only log / sqrt / where / fma-style arithmetic (no sin/cos), all of
    which lower cleanly in Mosaic and in the CPU interpret fallback.
    """
    w = -jnp.log((1.0 - x) * (1.0 + x))
    # Central branch (w < 5).
    wc = w - 2.5
    pc = jnp.float32(2.81022636e-08)
    for c in (3.43273939e-07, -3.5233877e-06, -4.39150654e-06, 2.1858087e-04,
              -1.25372503e-03, -4.17768164e-03, 2.46640727e-01, 1.50140941e+00):
        pc = jnp.float32(c) + pc * wc
    # Tail branch (w >= 5).
    wt = jnp.sqrt(w) - 3.0
    pt = jnp.float32(-2.00214257e-04)
    for c in (1.00950558e-04, 1.34934322e-03, -3.67342844e-03, 5.73950773e-03,
              -7.6224613e-03, 9.43887047e-03, 1.00167406e+00, 2.83297682e+00):
        pt = jnp.float32(c) + pt * wt
    return jnp.where(w < 5.0, pc, pt) * x


def _gaussian_kernel(seed_ref, params_ref, x_ref, o_ref):
    # seed_ref:   SMEM int32[1]     -- PRNG seed
    # params_ref: SMEM float32[2]   -- [mean, stddev]
    # x_ref/o_ref: VMEM (bm, bn) tiles of the lane-dense slab
    bm, bn = x_ref.shape
    mean = params_ref[0]
    stddev = params_ref[1]

    # Global element index of each element in this tile (the PRNG counter).
    # (int32 counter wraps only past 2^31 elements; noise stays well formed.)
    row = jax.lax.broadcasted_iota(jnp.int32, (bm, bn), 0) + pl.program_id(0) * bm
    col = jax.lax.broadcasted_iota(jnp.int32, (bm, bn), 1)
    lin = (row * bn + col).astype(jnp.uint32)

    seed = seed_ref[0].astype(jnp.uint32) * jnp.uint32(0x9E3779B9)
    bits = _hash_u32(lin ^ seed)

    # 24-bit uniform strictly inside (0, 1), then invert the normal CDF.
    u = (bits >> 8).astype(jnp.int32).astype(jnp.float32) * jnp.float32(1.0 / (1 << 24))
    u = u + jnp.float32(0.5 / (1 << 24))
    z = _SQRT2 * _erfinv(2.0 * u - 1.0)          # ~ N(0, 1)

    noise = mean + stddev * z
    o_ref[...] = (x_ref[...].astype(jnp.float32) + noise).astype(o_ref.dtype)


def gaussian_attack(x, *, mean=0.0, stddev=0.1, seed=0):
    """out = x + N(mean, stddev) noise, same shape/dtype as x (any shape)."""
    orig_shape = x.shape
    total = x.size

    # Lane-dense 2D slab: pad flat length to a multiple of 1024 (= 8*128).
    padded = pl.cdiv(total, _LANE_COLS) * _LANE_COLS
    flat = x.reshape(-1)
    if padded != total:
        flat = jnp.pad(flat, (0, padded - total))
    nrows = padded // _LANE_COLS
    x2d = flat.reshape(nrows, _LANE_COLS)

    # Row-tiled grid; block row dim is either the full extent (tiny inputs)
    # or a multiple of 8, so the (8, 128) BlockSpec constraint always holds.
    bm = nrows if nrows <= _MAX_BLOCK_ROWS else _MAX_BLOCK_ROWS
    grid = (pl.cdiv(nrows, bm),)

    seed_arr = jnp.asarray([seed], dtype=jnp.int32)
    params = jnp.asarray([mean, stddev], dtype=jnp.float32)

    out2d = pl.pallas_call(
        _gaussian_kernel,
        out_shape=jax.ShapeDtypeStruct((nrows, _LANE_COLS), x.dtype),
        grid=grid,
        in_specs=[
            pl.BlockSpec(memory_space=pltpu.MemorySpace.SMEM),   # seed
            pl.BlockSpec(memory_space=pltpu.MemorySpace.SMEM),   # [mean, stddev]
            pl.BlockSpec((bm, _LANE_COLS), lambda i: (i, 0)),    # x tile
        ],
        out_specs=pl.BlockSpec((bm, _LANE_COLS), lambda i: (i, 0)),
        compiler_params=pltpu.CompilerParams(
            dimension_semantics=("parallel",),   # v7x: shard rows across 2 TCs
        ),
    )(seed_arr, params, x2d)

    return out2d.reshape(-1)[:total].reshape(orig_shape)


if __name__ == "__main__":
    key = jax.random.PRNGKey(0)
    # Small NCHW input consistent with an image-watermarking noise layer.
    x = jax.random.normal(key, (2, 4, 16, 16), dtype=jnp.float32)

    out = gaussian_attack(x, mean=0.0, stddev=0.1, seed=1234)
    out = jax.block_until_ready(out)

    # Sanity checks: shape/dtype preserved, finite, noise ~ N(0, 0.1).
    assert out.shape == x.shape and out.dtype == x.dtype
    assert bool(jnp.all(jnp.isfinite(out)))
    noise = out - x
    assert float(jnp.max(jnp.abs(noise))) < 1.0
    assert abs(float(jnp.mean(noise))) < 0.02
    n_std = float(jnp.std(noise))
    assert 0.07 < n_std < 0.13, n_std

    print("KERNEL_OK")
</pallas_src>

<mosaic_0001>
module attributes {stable_mosaic.version = 11 : i64} {
  func.func @_gaussian_kernel(%arg0: i32, %arg1: memref<1xi32, #tpu.memory_space<smem>>, %arg2: memref<2xf32, #tpu.memory_space<smem>>, %arg3: memref<2x1024xf32, #tpu.memory_space<vmem>>, %arg4: memref<2x1024xf32, #tpu.memory_space<vmem>>) attributes {dimension_semantics = [#tpu.dimension_semantics<parallel>], iteration_bounds = array<i64: 1>, scalar_prefetch = 0 : i64, scratch_operands = 0 : i64, tpu.core_type = #tpu.core_type<tc>, window_params = [{transform_indices = @transform_0, window_bounds = array<i64: 1>}, {transform_indices = @transform_1, window_bounds = array<i64: 2>}, {transform_indices = @transform_2, window_bounds = array<i64: 2, 1024>}, {transform_indices = @transform_3, window_bounds = array<i64: 2, 1024>}]} {
    %c0 = arith.constant 0 : index
    %0 = memref.load %arg2[%c0] : memref<2xf32, #tpu.memory_space<smem>>
    %c1 = arith.constant 1 : index
    %1 = memref.load %arg2[%c1] : memref<2xf32, #tpu.memory_space<smem>>
    %2 = tpu.iota {dimensions = array<i32: 0>} : vector<2x1024xi32>
    %c2_i32 = arith.constant 2 : i32
    %3 = arith.muli %arg0, %c2_i32 : i32
    %4 = vector.broadcast %3 : i32 to vector<2x1024xi32>
    %5 = arith.addi %2, %4 : vector<2x1024xi32>
    %6 = tpu.iota {dimensions = array<i32: 1>} : vector<2x1024xi32>
    %c1024_i32 = arith.constant 1024 : i32
    %7 = vector.broadcast %c1024_i32 : i32 to vector<2x1024xi32>
    %8 = arith.muli %5, %7 : vector<2x1024xi32>
    %9 = arith.addi %8, %6 : vector<2x1024xi32>
    %c0_0 = arith.constant 0 : index
    %10 = memref.load %arg1[%c0_0] : memref<1xi32, #tpu.memory_space<smem>>
    %c-1640531527_i32 = arith.constant -1640531527 : i32
    %11 = arith.muli %10, %c-1640531527_i32 : i32
    %12 = vector.broadcast %11 : i32 to vector<2x1024xi32>
    %13 = arith.xori %9, %12 : vector<2x1024xi32>
    %c16_i32 = arith.constant 16 : i32
    %14 = vector.broadcast %c16_i32 : i32 to vector<2x1024xi32>
    %15 = arith.shrui %13, %14 : vector<2x1024xi32>
    %16 = arith.xori %13, %15 : vector<2x1024xi32>
    %c2146121005_i32 = arith.constant 2146121005 : i32
    %17 = vector.broadcast %c2146121005_i32 : i32 to vector<2x1024xi32>
    %18 = arith.muli %16, %17 : vector<2x1024xi32>
    %c15_i32 = arith.constant 15 : i32
    %19 = vector.broadcast %c15_i32 : i32 to vector<2x1024xi32>
    %20 = arith.shrui %18, %19 : vector<2x1024xi32>
    %21 = arith.xori %18, %20 : vector<2x1024xi32>
    %c-2073254261_i32 = arith.constant -2073254261 : i32
    %22 = vector.broadcast %c-2073254261_i32 : i32 to vector<2x1024xi32>
    %23 = arith.muli %21, %22 : vector<2x1024xi32>
    %c16_i32_1 = arith.constant 16 : i32
    %24 = vector.broadcast %c16_i32_1 : i32 to vector<2x1024xi32>
    %25 = arith.shrui %23, %24 : vector<2x1024xi32>
    %26 = arith.xori %23, %25 : vector<2x1024xi32>
    %c8_i32 = arith.constant 8 : i32
    %27 = vector.broadcast %c8_i32 : i32 to vector<2x1024xi32>
    %28 = arith.shrui %26, %27 : vector<2x1024xi32>
    %29 = arith.sitofp %28 : vector<2x1024xi32> to vector<2x1024xf32>
    %cst = arith.constant 5.96046448E-8 : f32
    %30 = vector.broadcast %cst : f32 to vector<2x1024xf32>
    %31 = arith.mulf %29, %30 : vector<2x1024xf32>
    %cst_2 = arith.constant 2.98023224E-8 : f32
    %32 = vector.broadcast %cst_2 : f32 to vector<2x1024xf32>
    %33 = arith.addf %31, %32 : vector<2x1024xf32>
    %cst_3 = arith.constant 2.000000e+00 : f32
    %34 = vector.broadcast %cst_3 : f32 to vector<2x1024xf32>
    %35 = arith.mulf %34, %33 : vector<2x1024xf32>
    %cst_4 = arith.constant 1.000000e+00 : f32
    %36 = vector.broadcast %cst_4 : f32 to vector<2x1024xf32>
    %37 = arith.subf %35, %36 : vector<2x1024xf32>
    %cst_5 = arith.constant 1.000000e+00 : f32
    %38 = vector.broadcast %cst_5 : f32 to vector<2x1024xf32>
    %39 = arith.subf %38, %37 : vector<2x1024xf32>
    %cst_6 = arith.constant 1.000000e+00 : f32
    %40 = vector.broadcast %cst_6 : f32 to vector<2x1024xf32>
    %41 = arith.addf %40, %37 : vector<2x1024xf32>
    %42 = arith.mulf %39, %41 : vector<2x1024xf32>
    %43 = math.log %42 : vector<2x1024xf32>
    %cst_7 = arith.constant 0.000000e+00 : f32
    %44 = vector.broadcast %cst_7 : f32 to vector<2x1024xf32>
    %45 = arith.subf %44, %43 : vector<2x1024xf32>
    %cst_8 = arith.constant 2.500000e+00 : f32
    %46 = vector.broadcast %cst_8 : f32 to vector<2x1024xf32>
    %47 = arith.subf %45, %46 : vector<2x1024xf32>
    %cst_9 = arith.constant 2.81022636E-8 : f32
    %48 = vector.broadcast %cst_9 : f32 to vector<2x1024xf32>
    %49 = arith.mulf %48, %47 : vector<2x1024xf32>
    %cst_10 = arith.constant 3.43273939E-7 : f32
    %50 = vector.broadcast %cst_10 : f32 to vector<2x1024xf32>
    %51 = arith.addf %50, %49 : vector<2x1024xf32>
    %52 = arith.mulf %51, %47 : vector<2x1024xf32>
    %cst_11 = arith.constant -3.5233877E-6 : f32
    %53 = vector.broadcast %cst_11 : f32 to vector<2x1024xf32>
    %54 = arith.addf %53, %52 : vector<2x1024xf32>
    %55 = arith.mulf %54, %47 : vector<2x1024xf32>
    %cst_12 = arith.constant -4.39150654E-6 : f32
    %56 = vector.broadcast %cst_12 : f32 to vector<2x1024xf32>
    %57 = arith.addf %56, %55 : vector<2x1024xf32>
    %58 = arith.mulf %57, %47 : vector<2x1024xf32>
    %cst_13 = arith.constant 2.1858087E-4 : f32
    %59 = vector.broadcast %cst_13 : f32 to vector<2x1024xf32>
    %60 = arith.addf %59, %58 : vector<2x1024xf32>
    %61 = arith.mulf %60, %47 : vector<2x1024xf32>
    %cst_14 = arith.constant -0.00125372503 : f32
    %62 = vector.broadcast %cst_14 : f32 to vector<2x1024xf32>
    %63 = arith.addf %62, %61 : vector<2x1024xf32>
    %64 = arith.mulf %63, %47 : vector<2x1024xf32>
    %cst_15 = arith.constant -0.00417768164 : f32
    %65 = vector.broadcast %cst_15 : f32 to vector<2x1024xf32>
    %66 = arith.addf %65, %64 : vector<2x1024xf32>
    %67 = arith.mulf %66, %47 : vector<2x1024xf32>
    %cst_16 = arith.constant 0.246640727 : f32
    %68 = vector.broadcast %cst_16 : f32 to vector<2x1024xf32>
    %69 = arith.addf %68, %67 : vector<2x1024xf32>
    %70 = arith.mulf %69, %47 : vector<2x1024xf32>
    %cst_17 = arith.constant 1.50140941 : f32
    %71 = vector.broadcast %cst_17 : f32 to vector<2x1024xf32>
    %72 = arith.addf %71, %70 : vector<2x1024xf32>
    %73 = math.sqrt %45 : vector<2x1024xf32>
    %cst_18 = arith.constant 3.000000e+00 : f32
    %74 = vector.broadcast %cst_18 : f32 to vector<2x1024xf32>
    %75 = arith.subf %73, %74 : vector<2x1024xf32>
    %cst_19 = arith.constant -2.00214257E-4 : f32
    %76 = vector.broadcast %cst_19 : f32 to vector<2x1024xf32>
    %77 = arith.mulf %76, %75 : vector<2x1024xf32>
    %cst_20 = arith.constant 1.00950558E-4 : f32
    %78 = vector.broadcast %cst_20 : f32 to vector<2x1024xf32>
    %79 = arith.addf %78, %77 : vector<2x1024xf32>
    %80 = arith.mulf %79, %75 : vector<2x1024xf32>
    %cst_21 = arith.constant 0.00134934322 : f32
    %81 = vector.broadcast %cst_21 : f32 to vector<2x1024xf32>
    %82 = arith.addf %81, %80 : vector<2x1024xf32>
    %83 = arith.mulf %82, %75 : vector<2x1024xf32>
    %cst_22 = arith.constant -0.00367342844 : f32
    %84 = vector.broadcast %cst_22 : f32 to vector<2x1024xf32>
    %85 = arith.addf %84, %83 : vector<2x1024xf32>
    %86 = arith.mulf %85, %75 : vector<2x1024xf32>
    %cst_23 = arith.constant 0.00573950773 : f32
    %87 = vector.broadcast %cst_23 : f32 to vector<2x1024xf32>
    %88 = arith.addf %87, %86 : vector<2x1024xf32>
    %89 = arith.mulf %88, %75 : vector<2x1024xf32>
    %cst_24 = arith.constant -0.0076224613 : f32
    %90 = vector.broadcast %cst_24 : f32 to vector<2x1024xf32>
    %91 = arith.addf %90, %89 : vector<2x1024xf32>
    %92 = arith.mulf %91, %75 : vector<2x1024xf32>
    %cst_25 = arith.constant 0.00943887047 : f32
    %93 = vector.broadcast %cst_25 : f32 to vector<2x1024xf32>
    %94 = arith.addf %93, %92 : vector<2x1024xf32>
    %95 = arith.mulf %94, %75 : vector<2x1024xf32>
    %cst_26 = arith.constant 1.00167406 : f32
    %96 = vector.broadcast %cst_26 : f32 to vector<2x1024xf32>
    %97 = arith.addf %96, %95 : vector<2x1024xf32>
    %98 = arith.mulf %97, %75 : vector<2x1024xf32>
    %cst_27 = arith.constant 2.83297682 : f32
    %99 = vector.broadcast %cst_27 : f32 to vector<2x1024xf32>
    %100 = arith.addf %99, %98 : vector<2x1024xf32>
    %cst_28 = arith.constant 5.000000e+00 : f32
    %101 = vector.broadcast %cst_28 : f32 to vector<2x1024xf32>
    %102 = arith.cmpf olt, %45, %101 : vector<2x1024xf32>
    %103 = arith.select %102, %72, %100 : vector<2x1024xi1>, vector<2x1024xf32>
    %104 = arith.mulf %103, %37 : vector<2x1024xf32>
    %cst_29 = arith.constant 1.41421354 : f32
    %105 = vector.broadcast %cst_29 : f32 to vector<2x1024xf32>
    %106 = arith.mulf %105, %104 : vector<2x1024xf32>
    %107 = vector.broadcast %1 : f32 to vector<2x1024xf32>
    %108 = arith.mulf %107, %106 : vector<2x1024xf32>
    %109 = vector.broadcast %0 : f32 to vector<2x1024xf32>
    %110 = arith.addf %109, %108 : vector<2x1024xf32>
    %c0_30 = arith.constant 0 : index
    %c0_31 = arith.constant 0 : index
    %111 = vector.load %arg3[%c0_30, %c0_31] : memref<2x1024xf32, #tpu.memory_space<vmem>>, vector<2x1024xf32>
    %112 = arith.addf %111, %110 : vector<2x1024xf32>
    %c0_32 = arith.constant 0 : index
    %c0_33 = arith.constant 0 : index
    %113 = vector.load %arg4[%c0_32, %c0_33] : memref<2x1024xf32, #tpu.memory_space<vmem>>, vector<2x1024xf32>
    tpu.vector_store %arg4[%c0_32, %c0_33], %112 {strides = array<i32>} : memref<2x1024xf32, #tpu.memory_space<vmem>>, vector<2x1024xf32>,
    return
  }
  func.func @transform_0(%arg0: i32) -> i32 {
    %c0_i32 = arith.constant 0 : i32
    %c0_i32_0 = arith.constant 0 : i32
    return %c0_i32 : i32
  }
  func.func @transform_1(%arg0: i32) -> i32 {
    %c0_i32 = arith.constant 0 : i32
    %c0_i32_0 = arith.constant 0 : i32
    return %c0_i32 : i32
  }
  func.func @transform_2(%arg0: i32) -> (i32, i32) {
    %c0_i32 = arith.constant 0 : i32
    %c0_i32_0 = arith.constant 0 : i32
    return %arg0, %c0_i32 : i32, i32
  }
  func.func @transform_3(%arg0: i32) -> (i32, i32) {
    %c0_i32 = arith.constant 0 : i32
    %c0_i32_0 = arith.constant 0 : i32
    return %arg0, %c0_i32 : i32, i32
  }
}

</mosaic_0001>

<bundles_post_ra>
// kernel: tpu_custom_call.1
= control target key start
LH: loop header
LB: loop body
LE: loop exit
PB: predicated region body
PF: predicated region fallthrough
CT: control target
= control target key end

     0   :  { %9 = vsyncpa [#allocation6], 0  ;;  %s1247_s0 = inlined_call_operand.<no memory space> [shape: s32[1], index: 0, kind: input, shape index: {}]   ;;  %s1248_s1 = inlined_call_operand.vmem [shape: f32[2], index: 1, kind: input, shape index: {}]   ;;  %s1249_s2 = inlined_call_operand.hbm [shape: f32[2,1024], index: 2, kind: input, shape index: {}]   ;;  %s1250_s3 = inlined_call_operand.hbm [shape: f32[2,1024], index: 3, kind: output, shape index: {}]  }
   0x1   :  { %10 = vsyncpa [#allocation4], 0 }
   0x2   :  { %11 = vsyncpa [#allocation5], 0  ;;  %s20_s14 = sshll.u32 %s1248_s1, 4  ;;  %s21_s14 = int_to_ptr.vmem [resolvable:$true] %s20_s14 }
   0x3   :  { %s742_s15 = scalar_lea.vmem %s21_s14, 16  ;;  %p747_p1 = scmp.lt.s32.totalorder %s21_s14, %s21_s14 }
   0x4   :  { %p743_p0 = scmp.ne.s32.totalorder %s21_s14, %s742_s15  ;;  %p748_p2 = scmp.lt.s32.totalorder %s742_s15, %s742_s15 }
   0x6   :  { %p749_p3 = por %p748_p2, %p747_p1 }
   0x8   :  { %p750_p4 = pnand %p749_p3, %p743_p0 }
   0xa   :  { %753 = shalt.err (!%p750_p4)
}
   0xb   :  { %s804_s16 = smov [#allocation3]   ;;  %s805_s17 = smov [#allocation7]  }
   0xc   :  { %23 = dma.vmem_to_smem %s21_s14, 16, %s804_s16, [#allocation6]  }
   0xd   :  { %s30_s18 = sshll.u32 %s805_s17, 4  ;;  %s754_s21 = scalar_lea.hbm %s1249_s2, 256  ;;  %s31_s18 = int_to_ptr.vmem [resolvable:$true] %s30_s18 }
   0xe   :  { %p755_p5 = scmp.ne.s32.totalorder %s1249_s2, %s754_s21  ;;  %p758_p6 = scmp.lt.u32.totalorder %s754_s21, %s1249_s2 }
  0x10   :  { %p760_p7 = pnand %p758_p6, %p755_p5 }
  0x12   :  { %763 = shalt.err (!%p760_p7)
}
  0x13   :  { %s764_s25 = scalar_lea.vmem %s31_s18, 256  ;;  %p769_p9 = scmp.lt.s32.totalorder %s31_s18, %s31_s18 }
  0x14   :  { %p765_p8 = scmp.ne.s32.totalorder %s31_s18, %s764_s25  ;;  %p770_p10 = scmp.lt.s32.totalorder %s764_s25, %s764_s25 }
  0x16   :  { %p771_p11 = por %p770_p10, %p769_p9 }
  0x18   :  { %p772_p12 = pnand %p771_p11, %p765_p8 }
  0x1a   :  { %775 = shalt.err (!%p772_p12)
}
  0x1b   :  { %33 = dma.hbm_to_vmem [thread:$0]  %s1249_s2, 256, %s31_s18, [#allocation4]  }
  0x1c   :  { %798 = dma.done.wait [#allocation6], 16  }
  0x1d   :  { %799 = vsyncadd [#allocation6], 4294967280 }
  0x1e   :  { %800 = dma.done.wait [#allocation4], 256  }
  0x1f   :  { %801 = vsyncadd [#allocation4], 4294967040 }
  0x20   :  { %40 = sfence }
  0x21   :  { %v43_v0 = vlaneseq  ;;  %s67_s30 = smul.u32 2654435769, %s1247_s0  ;;  %s978_s0 = sld [smem:[#allocation3]] }
  0x22   :  { %s681_s2 = sld [smem:[#allocation3 + $0x1]]  ;;  %s807_s4 = smov [#allocation8]  }
  0x23   :  { %v843_v1 = vshrl.u32 %v43_v0, 7  ;;  %v49_v2 = vand.u32 127, %v43_v0  ;;  %v68_v11 = vstv %s67_s30  ;;  %s671_s5 = sshll.u32 %s807_s4, 4  ;;  %s672_s5 = int_to_ptr.vmem [resolvable:$true] %s671_s5 }
  0x24   :  { %s776_s6 = scalar_lea.vmem %s672_s5, 256  ;;  %p781_p0 = scmp.lt.s32.totalorder %s672_s5, %s672_s5 }
  0x25   :  { %v50_v3 = vadd.s32 128, %v49_v2  ;;  %v51_v4 = vadd.s32 256, %v49_v2  ;;  %v52_v5 = vadd.s32 384, %v49_v2  ;;  %v53_v6 = vadd.s32 512, %v49_v2  ;;  %p777_p13 = scmp.ne.s32.totalorder %s672_s5, %s776_s6  ;;  %p782_p1 = scmp.lt.s32.totalorder %s776_s6, %s776_s6 }
  0x26   :  { %v54_v7 = vadd.s32 640, %v49_v2  ;;  %v55_v8 = vadd.s32 768, %v49_v2  ;;  %v56_v9 = vadd.s32 896, %v49_v2  ;;  %v57_v10 = vmul.u32 1024, %v843_v1 }
  0x27   :  { %p783_p2 = por %p782_p1, %p781_p0 }
  0x28   :  { %v58_v12 = vadd.s32 %v57_v10, %v49_v2  ;;  %v59_v13 = vadd.s32 %v57_v10, %v50_v3  ;;  %v60_v14 = vadd.s32 %v57_v10, %v51_v4  ;;  %v61_v15 = vadd.s32 %v57_v10, %v52_v5 }
  0x29   :  { %v62_v16 = vadd.s32 %v57_v10, %v53_v6  ;;  %v63_v17 = vadd.s32 %v57_v10, %v54_v7  ;;  %v64_v18 = vadd.s32 %v57_v10, %v55_v8  ;;  %v65_v19 = vadd.s32 %v57_v10, %v56_v9  ;;  %p784_p3 = pnand %p783_p2, %p777_p13 }
  0x2a   :  { %v69_v20 = vxor.u32 %v68_v11, %v58_v12  ;;  %v70_v21 = vxor.u32 %v68_v11, %v59_v13  ;;  %v71_v22 = vxor.u32 %v68_v11, %v60_v14  ;;  %v72_v23 = vxor.u32 %v68_v11, %v61_v15 }
  0x2b   :  { %v73_v24 = vxor.u32 %v68_v11, %v62_v16  ;;  %v74_v25 = vxor.u32 %v68_v11, %v63_v17  ;;  %v75_v26 = vxor.u32 %v68_v11, %v64_v18  ;;  %v76_v27 = vxor.u32 %v68_v11, %v65_v19 }
  0x2c   :  { %v77_v28 = vshrl.u32 %v69_v20, 16  ;;  %v78_v29 = vshrl.u32 %v70_v21, 16  ;;  %v79_v30 = vshrl.u32 %v71_v22, 16  ;;  %v80_v31 = vshrl.u32 %v72_v23, 16 }
  0x2d   :  { %v81_v32 = vshrl.u32 %v73_v24, 16  ;;  %v82_v33 = vshrl.u32 %v74_v25, 16  ;;  %v83_v34 = vshrl.u32 %v75_v26, 16  ;;  %v84_v35 = vshrl.u32 %v76_v27, 16 }
  0x2e   :  { %v85_v36 = vxor.u32 %v77_v28, %v69_v20  ;;  %v86_v37 = vxor.u32 %v78_v29, %v70_v21  ;;  %v87_v38 = vxor.u32 %v79_v30, %v71_v22  ;;  %v88_v39 = vxor.u32 %v80_v31, %v72_v23 }
  0x2f   :  { %v89_v40 = vxor.u32 %v81_v32, %v73_v24  ;;  %v90_v41 = vxor.u32 %v82_v33, %v74_v25  ;;  %v91_v42 = vxor.u32 %v83_v34, %v75_v26  ;;  %v92_v43 = vxor.u32 %v84_v35, %v76_v27 }
  0x30   :  { %v93_v44 = vmul.u32 2146121005, %v85_v36  ;;  %v94_v45 = vmul.u32 2146121005, %v86_v37 }
  0x31   :  { %v95_v46 = vmul.u32 2146121005, %v87_v38  ;;  %v96_v47 = vmul.u32 2146121005, %v88_v39 }
  0x32   :  { %v97_v48 = vmul.u32 2146121005, %v89_v40  ;;  %v98_v49 = vmul.u32 2146121005, %v90_v41  ;;  %v101_v50 = vshrl.u32 %v93_v44, 15  ;;  %v102_v51 = vshrl.u32 %v94_v45, 15 }
  0x33   :  { %v99_v52 = vmul.u32 2146121005, %v91_v42  ;;  %v100_v53 = vmul.u32 2146121005, %v92_v43  ;;  %v103_v54 = vshrl.u32 %v95_v46, 15  ;;  %v104_v55 = vshrl.u32 %v96_v47, 15 }
  0x34   :  { %v105_v56 = vshrl.u32 %v97_v48, 15  ;;  %v106_v57 = vshrl.u32 %v98_v49, 15  ;;  %v109_v58 = vxor.u32 %v101_v50, %v93_v44  ;;  %v110_v59 = vxor.u32 %v102_v51, %v94_v45 }
  0x35   :  { %v107_v60 = vshrl.u32 %v99_v52, 15  ;;  %v108_v61 = vshrl.u32 %v100_v53, 15  ;;  %v111_v62 = vxor.u32 %v103_v54, %v95_v46  ;;  %v112_v63 = vxor.u32 %v104_v55, %v96_v47 }
  0x36   :  { %v113_v0 = vxor.u32 %v105_v56, %v97_v48  ;;  %v114_v2 = vxor.u32 %v106_v57, %v98_v49  ;;  %v117_v3 = vmul.u32 2221713035, %v109_v58  ;;  %v118_v4 = vmul.u32 2221713035, %v110_v59 }
  0x37   :  { %v115_v5 = vxor.u32 %v107_v60, %v99_v52  ;;  %v116_v6 = vxor.u32 %v108_v61, %v100_v53  ;;  %v119_v7 = vmul.u32 2221713035, %v111_v62  ;;  %v120_v8 = vmul.u32 2221713035, %v112_v63 }
  0x38   :  { %v121_v9 = vmul.u32 2221713035, %v113_v0  ;;  %v122_v10 = vmul.u32 2221713035, %v114_v2  ;;  %v125_v11 = vshrl.u32 %v117_v3, 16  ;;  %v126_v12 = vshrl.u32 %v118_v4, 16 }
  0x39   :  { %v123_v13 = vmul.u32 2221713035, %v115_v5  ;;  %v124_v14 = vmul.u32 2221713035, %v116_v6  ;;  %v127_v15 = vshrl.u32 %v119_v7, 16  ;;  %v128_v16 = vshrl.u32 %v120_v8, 16 }
  0x3a   :  { %v129_v17 = vshrl.u32 %v121_v9, 16  ;;  %v130_v18 = vshrl.u32 %v122_v10, 16  ;;  %v133_v19 = vxor.u32 %v125_v11, %v117_v3  ;;  %v134_v20 = vxor.u32 %v126_v12, %v118_v4 }
  0x3b   :  { %v131_v21 = vshrl.u32 %v123_v13, 16  ;;  %v132_v22 = vshrl.u32 %v124_v14, 16  ;;  %v135_v23 = vxor.u32 %v127_v15, %v119_v7  ;;  %v136_v24 = vxor.u32 %v128_v16, %v120_v8 }
  0x3c   :  { %v137_v25 = vxor.u32 %v129_v17, %v121_v9  ;;  %v138_v26 = vxor.u32 %v130_v18, %v122_v10  ;;  %v141_v27 = vshrl.u32 %v133_v19, 8  ;;  %v142_v28 = vshrl.u32 %v134_v20, 8 }
  0x3d   :  { %v139_v29 = vxor.u32 %v131_v21, %v123_v13  ;;  %v140_v30 = vxor.u32 %v132_v22, %v124_v14  ;;  %v143_v31 = vshrl.u32 %v135_v23, 8  ;;  %v144_v32 = vshrl.u32 %v136_v24, 8 }
  0x3e   :  { %v145_v33 = vshrl.u32 %v137_v25, 8  ;;  %v146_v34 = vshrl.u32 %v138_v26, 8  ;;  %v149_v35 = vcvt.s32.f32 %v141_v27  ;;  %v150_v36 = vcvt.s32.f32 %v142_v28 }
  0x3f   :  { %v147_v37 = vshrl.u32 %v139_v29, 8  ;;  %v148_v38 = vshrl.u32 %v140_v30, 8  ;;  %v151_v39 = vcvt.s32.f32 %v143_v31  ;;  %v152_v40 = vcvt.s32.f32 %v144_v32 }
  0x40   :  { %v153_v41 = vcvt.s32.f32 %v145_v33  ;;  %v154_v42 = vcvt.s32.f32 %v146_v34  ;;  %v157_v43 = vmul.f32 5.9604645e-08, %v149_v35  ;;  %v158_v44 = vmul.f32 5.9604645e-08, %v150_v36 }
  0x41   :  { %v155_v45 = vcvt.s32.f32 %v147_v37  ;;  %v156_v46 = vcvt.s32.f32 %v148_v38  ;;  %v159_v47 = vmul.f32 5.9604645e-08, %v151_v39  ;;  %v160_v48 = vmul.f32 5.9604645e-08, %v152_v40 }
  0x42   :  { %v161_v49 = vmul.f32 5.9604645e-08, %v153_v41  ;;  %v162_v50 = vmul.f32 5.9604645e-08, %v154_v42  ;;  %v165_v51 = vadd.f32 2.9802322e-08, %v157_v43  ;;  %v166_v52 = vadd.f32 2.9802322e-08, %v158_v44 }
  0x43   :  { %v163_v53 = vmul.f32 5.9604645e-08, %v155_v45  ;;  %v164_v54 = vmul.f32 5.9604645e-08, %v156_v46  ;;  %v167_v55 = vadd.f32 2.9802322e-08, %v159_v47  ;;  %v168_v56 = vadd.f32 2.9802322e-08, %v160_v48 }
  0x44   :  { %v169_v57 = vadd.f32 2.9802322e-08, %v161_v49  ;;  %v170_v58 = vadd.f32 2.9802322e-08, %v162_v50  ;;  %v173_v59 = vmul.f32 2.0, %v165_v51  ;;  %v174_v60 = vmul.f32 2.0, %v166_v52 }
  0x45   :  { %v171_v61 = vadd.f32 2.9802322e-08, %v163_v53  ;;  %v172_v62 = vadd.f32 2.9802322e-08, %v164_v54  ;;  %v175_v63 = vmul.f32 2.0, %v167_v55  ;;  %v176_v0 = vmul.f32 2.0, %v168_v56 }
  0x46   :  { %v177_v2 = vmul.f32 2.0, %v169_v57  ;;  %v178_v3 = vmul.f32 2.0, %v170_v58  ;;  %v849_v4 = vadd.f32 -1.0, %v173_v59  ;;  %v851_v5 = vadd.f32 -1.0, %v174_v60 }
  0x47   :  { %v179_v6 = vmul.f32 2.0, %v171_v61  ;;  %v180_v7 = vmul.f32 2.0, %v172_v62  ;;  %v853_v8 = vadd.f32 -1.0, %v175_v63  ;;  %v855_v9 = vadd.f32 -1.0, %v176_v0 }
  0x48   :  { %v857_v10 = vadd.f32 -1.0, %v177_v2  ;;  %v859_v11 = vadd.f32 -1.0, %v178_v3  ;;  %v189_v13 = vsub.f32 1.0, %v849_v4  ;;  %v190_v14 = vsub.f32 1.0, %v851_v5 }
  0x49   :  { %v861_v12 = vadd.f32 -1.0, %v179_v6  ;;  %v191_v15 = vsub.f32 1.0, %v853_v8  ;;  %v866_v16 = vadd.f32 -1.0, %v180_v7  ;;  %v192_v17 = vsub.f32 1.0, %v855_v9 }
  0x4a   :  { %v197_v18 = vadd.f32 1.0, %v849_v4  ;;  %v198_v19 = vadd.f32 1.0, %v851_v5  ;;  %v193_v20 = vsub.f32 1.0, %v857_v10  ;;  %v199_v21 = vadd.f32 1.0, %v853_v8 }
  0x4b   :  { %v200_v22 = vadd.f32 1.0, %v855_v9  ;;  %v194_v23 = vsub.f32 1.0, %v859_v11  ;;  %v195_v24 = vsub.f32 1.0, %v861_v12  ;;  %v201_v25 = vadd.f32 1.0, %v857_v10 }
  0x4c   :  { %v202_v26 = vadd.f32 1.0, %v859_v11  ;;  %v203_v27 = vadd.f32 1.0, %v861_v12  ;;  %v205_v28 = vmul.f32 %v197_v18, %v189_v13  ;;  %v206_v29 = vmul.f32 %v198_v19, %v190_v14 }
  0x4d   :  { %v207_v30 = vmul.f32 %v199_v21, %v191_v15  ;;  %v196_v31 = vsub.f32 1.0, %v866_v16  ;;  %v204_v32 = vadd.f32 1.0, %v866_v16  ;;  %v208_v33 = vmul.f32 %v200_v22, %v192_v17 }
  0x4e   :  { %v209_v34 = vmul.f32 %v201_v25, %v193_v20  ;;  %710 = vlog2.f32 %v205_v28  ;;  %v210_v35 = vmul.f32 %v202_v26, %v194_v23  ;;  %v211_v36 = vmul.f32 %v203_v27, %v195_v24 }
  0x4f   :  { %712 = vlog2.f32 %v206_v29  ;;  %v212_v37 = vmul.f32 %v204_v32, %v196_v31 }
  0x50   :  { %714 = vlog2.f32 %v207_v30 }
  0x51   :  { %716 = vlog2.f32 %v208_v33 }
  0x52   :  { %718 = vlog2.f32 %v209_v34 }
  0x53   :  { %720 = vlog2.f32 %v210_v35 }
  0x54   :  { %722 = vlog2.f32 %v211_v36 }
  0x55   :  { %724 = vlog2.f32 %v212_v37 }
  0x58   :  { %v711_v38 = vpop.eup %710 }
  0x59   :  { %v713_v39 = vpop.eup %712  ;;  %v214_v40 = vmul.f32 0.6931472, %v711_v38 }
  0x5a   :  { %v715_v41 = vpop.eup %714  ;;  %v216_v42 = vmul.f32 0.6931472, %v713_v39 }
  0x5b   :  { %v717_v43 = vpop.eup %716  ;;  %v218_v44 = vmul.f32 0.6931472, %v715_v41  ;;  %v881_v45 = vsub.f32 0.0, %v214_v40 }
  0x5c   :  { %v719_v46 = vpop.eup %718  ;;  %v220_v47 = vmul.f32 0.6931472, %v717_v43  ;;  %v883_v48 = vsub.f32 0.0, %v216_v42 }
  0x5d   :  { %v721_v49 = vpop.eup %720  ;;  %v222_v50 = vmul.f32 0.6931472, %v719_v46  ;;  %v885_v51 = vsub.f32 0.0, %v218_v44  ;;  %v888_v52 = vadd.f32 -2.5, %v881_v45  ;;  %726 = vrsqrt.f32 %v881_v45 }
  0x5e   :  { %v723_v53 = vpop.eup %722  ;;  %v224_v54 = vmul.f32 0.6931472, %v721_v49  ;;  %v890_v55 = vsub.f32 0.0, %v220_v47  ;;  %v893_v56 = vadd.f32 -2.5, %v883_v48  ;;  %vm375_vm0 = vcmp.eq.f32.partialorder %v881_v45, inf }
  0x5f   :  { %v725_v57 = vpop.eup %724  ;;  %v226_v58 = vmul.f32 0.6931472, %v723_v53  ;;  %v896_v59 = vsub.f32 0.0, %v222_v50  ;;  %v899_v60 = vadd.f32 -2.5, %v885_v51  ;;  %v245_v61 = vmul.f32 2.8102264e-08, %v888_v52 }
  0x60   :  { %v228_v62 = vmul.f32 0.6931472, %v725_v57  ;;  %v902_v63 = vsub.f32 0.0, %v224_v54  ;;  %v905_v0 = vadd.f32 -2.5, %v890_v55  ;;  %v246_v2 = vmul.f32 2.8102264e-08, %v893_v56 }
  0x61   :  { %v908_v3 = vsub.f32 0.0, %v226_v58  ;;  %v911_v6 = vadd.f32 -2.5, %v896_v59  ;;  %v247_v7 = vmul.f32 2.8102264e-08, %v899_v60  ;;  %v253_v13 = vadd.f32 3.4327394e-07, %v245_v61 }
  0x62   :  { %v914_v14 = vsub.f32 0.0, %v228_v62  ;;  %v917_v15 = vadd.f32 -2.5, %v902_v63  ;;  %v248_v17 = vmul.f32 2.8102264e-08, %v905_v0  ;;  %v254_v18 = vadd.f32 3.4327394e-07, %v246_v2 }
  0x63   :  { %v921_v19 = vadd.f32 -2.5, %v908_v3  ;;  %v249_v20 = vmul.f32 2.8102264e-08, %v911_v6  ;;  %v255_v21 = vadd.f32 3.4327394e-07, %v247_v7  ;;  %v261_v22 = vmul.f32 %v888_v52, %v253_v13 }
  0x64   :  { %v926_v23 = vadd.f32 -2.5, %v914_v14  ;;  %v250_v24 = vmul.f32 2.8102264e-08, %v917_v15  ;;  %v256_v25 = vadd.f32 3.4327394e-07, %v248_v17  ;;  %v262_v26 = vmul.f32 %v893_v56, %v254_v18 }
  0x65   :  { %v251_v27 = vmul.f32 2.8102264e-08, %v921_v19  ;;  %v257_v28 = vadd.f32 3.4327394e-07, %v249_v20  ;;  %v263_v29 = vmul.f32 %v899_v60, %v255_v21  ;;  %v269_v30 = vadd.f32 -3.5233877e-06, %v261_v22 }
  0x66   :  { %v252_v31 = vmul.f32 2.8102264e-08, %v926_v23  ;;  %v258_v32 = vadd.f32 3.4327394e-07, %v250_v24  ;;  %v264_v33 = vmul.f32 %v905_v0, %v256_v25  ;;  %v270_v34 = vadd.f32 -3.5233877e-06, %v262_v26 }
  0x67   :  { %v259_v35 = vadd.f32 3.4327394e-07, %v251_v27  ;;  %v265_v36 = vmul.f32 %v911_v6, %v257_v28  ;;  %v271_v37 = vadd.f32 -3.5233877e-06, %v263_v29  ;;  %v277_v38 = vmul.f32 %v888_v52, %v269_v30  ;;  %v936_v39 = vpop.eup %726 }
  0x68   :  { %v260_v40 = vadd.f32 3.4327394e-07, %v252_v31  ;;  %v266_v41 = vmul.f32 %v917_v15, %v258_v32  ;;  %v272_v42 = vadd.f32 -3.5233877e-06, %v264_v33  ;;  %v278_v43 = vmul.f32 %v893_v56, %v270_v34 }
  0x69   :  { %v267_v44 = vmul.f32 %v921_v19, %v259_v35  ;;  %v273_v46 = vadd.f32 -3.5233877e-06, %v265_v36  ;;  %v279_v47 = vmul.f32 %v899_v60, %v271_v37  ;;  %v285_v49 = vadd.f32 -4.3915065e-06, %v277_v38 }
  0x6a   :  { %v268_v50 = vmul.f32 %v926_v23, %v260_v40  ;;  %v274_v53 = vadd.f32 -3.5233877e-06, %v266_v41  ;;  %v280_v54 = vmul.f32 %v905_v0, %v272_v42  ;;  %v286_v57 = vadd.f32 -4.3915065e-06, %v278_v43 }
  0x6b   :  { %v275_v58 = vadd.f32 -3.5233877e-06, %v267_v44  ;;  %v281_v61 = vmul.f32 %v911_v6, %v273_v46  ;;  %v287_v62 = vadd.f32 -4.3915065e-06, %v279_v47  ;;  %v293_v2 = vmul.f32 %v888_v52, %v285_v49 }
  0x6c   :  { %v276_v7 = vadd.f32 -3.5233877e-06, %v268_v50  ;;  %v282_v13 = vmul.f32 %v917_v15, %v274_v53  ;;  %v288_v17 = vadd.f32 -4.3915065e-06, %v280_v54  ;;  %v294_v18 = vmul.f32 %v893_v56, %v286_v57 }
  0x6d   :  { %v283_v20 = vmul.f32 %v921_v19, %v275_v58  ;;  %v289_v21 = vadd.f32 -4.3915065e-06, %v281_v61  ;;  %v295_v22 = vmul.f32 %v899_v60, %v287_v62  ;;  %v301_v24 = vadd.f32 0.00021858087, %v293_v2 }
  0x6e   :  { %v284_v25 = vmul.f32 %v926_v23, %v276_v7  ;;  %v290_v26 = vadd.f32 -4.3915065e-06, %v282_v13  ;;  %v296_v27 = vmul.f32 %v905_v0, %v288_v17  ;;  %v302_v28 = vadd.f32 0.00021858087, %v294_v18 }
  0x6f   :  { %v291_v29 = vadd.f32 -4.3915065e-06, %v283_v20  ;;  %v297_v30 = vmul.f32 %v911_v6, %v289_v21  ;;  %v303_v31 = vadd.f32 0.00021858087, %v295_v22  ;;  %v309_v32 = vmul.f32 %v888_v52, %v301_v24 }
  0x70   :  { %v292_v33 = vadd.f32 -4.3915065e-06, %v284_v25  ;;  %v298_v34 = vmul.f32 %v917_v15, %v290_v26  ;;  %v304_v35 = vadd.f32 0.00021858087, %v296_v27  ;;  %v310_v36 = vmul.f32 %v893_v56, %v302_v28 }
  0x71   :  { %v299_v37 = vmul.f32 %v921_v19, %v291_v29  ;;  %v305_v38 = vadd.f32 0.00021858087, %v297_v30  ;;  %v311_v40 = vmul.f32 %v899_v60, %v303_v31  ;;  %v317_v41 = vadd.f32 -0.001253725, %v309_v32 }
  0x72   :  { %v300_v42 = vmul.f32 %v926_v23, %v292_v33  ;;  %v306_v43 = vadd.f32 0.00021858087, %v298_v34  ;;  %v312_v44 = vmul.f32 %v905_v0, %v304_v35  ;;  %v318_v46 = vadd.f32 -0.001253725, %v310_v36 }
  0x73   :  { %v307_v47 = vadd.f32 0.00021858087, %v299_v37  ;;  %v313_v49 = vmul.f32 %v911_v6, %v305_v38  ;;  %v319_v50 = vadd.f32 -0.001253725, %v311_v40  ;;  %v325_v53 = vmul.f32 %v888_v52, %v317_v41 }
  0x74   :  { %v308_v54 = vadd.f32 0.00021858087, %v300_v42  ;;  %v314_v57 = vmul.f32 %v917_v15, %v306_v43  ;;  %v320_v58 = vadd.f32 -0.001253725, %v312_v44  ;;  %v326_v61 = vmul.f32 %v893_v56, %v318_v46 }
  0x75   :  { %v315_v62 = vmul.f32 %v921_v19, %v307_v47  ;;  %v321_v2 = vadd.f32 -0.001253725, %v313_v49  ;;  %v327_v7 = vmul.f32 %v899_v60, %v319_v50  ;;  %v333_v13 = vadd.f32 -0.0041776816, %v325_v53 }
  0x76   :  { %v316_v17 = vmul.f32 %v926_v23, %v308_v54  ;;  %v322_v18 = vadd.f32 -0.001253725, %v314_v57  ;;  %v328_v20 = vmul.f32 %v905_v0, %v320_v58  ;;  %v334_v21 = vadd.f32 -0.0041776816, %v326_v61 }
  0x77   :  { %v323_v22 = vadd.f32 -0.001253725, %v315_v62  ;;  %v329_v24 = vmul.f32 %v911_v6, %v321_v2  ;;  %v335_v25 = vadd.f32 -0.0041776816, %v327_v7  ;;  %v341_v33 = vmul.f32 %v888_v52, %v333_v13 }
  0x78   :  { %v324_v26 = vadd.f32 -0.001253725, %v316_v17  ;;  %v330_v27 = vmul.f32 %v917_v15, %v322_v18  ;;  %v336_v28 = vadd.f32 -0.0041776816, %v328_v20  ;;  %v342_v34 = vmul.f32 %v893_v56, %v334_v21 }
  0x79   :  { %v331_v29 = vmul.f32 %v921_v19, %v323_v22  ;;  %v337_v30 = vadd.f32 -0.0041776816, %v329_v24  ;;  %v343_v36 = vmul.f32 %v899_v60, %v335_v25  ;;  %v349_v44 = vadd.f32 0.24664073, %v341_v33 }
  0x7a   :  { %v332_v31 = vmul.f32 %v926_v23, %v324_v26  ;;  %v338_v32 = vadd.f32 -0.0041776816, %v330_v27  ;;  %v344_v37 = vmul.f32 %v905_v0, %v336_v28  ;;  %v350_v46 = vadd.f32 0.24664073, %v342_v34 }
  0x7b   :  { %v339_v35 = vadd.f32 -0.0041776816, %v331_v29  ;;  %v345_v38 = vmul.f32 %v911_v6, %v337_v30  ;;  %v351_v47 = vadd.f32 0.24664073, %v343_v36  ;;  %v374_v54 = vmul.f32 %v936_v39, %v881_v45 }
  0x7c   :  { %v340_v40 = vadd.f32 -0.0041776816, %v332_v31  ;;  %v346_v41 = vmul.f32 %v917_v15, %v338_v32  ;;  %v352_v49 = vadd.f32 0.24664073, %v344_v37  ;;  %v806_v58 = vmov 1983009808  }
  0x7d   :  { %v347_v42 = vmul.f32 %v921_v19, %v339_v35  ;;  %v353_v50 = vadd.f32 0.24664073, %v345_v38  ;;  %v985_v61 = vunpack.c.l.s4 %v806_v58  ;;  %v357_v2 = vmul.f32 %v888_v52, %v349_v44 }
  0x7e   :  { %v348_v43 = vmul.f32 %v926_v23, %v340_v40  ;;  %v354_v53 = vadd.f32 0.24664073, %v346_v41  ;;  %v358_v7 = vmul.f32 %v893_v56, %v350_v46  ;;  %728 = vrsqrt.f32 %v883_v48 }
  0x7f   :  { %v355_v57 = vadd.f32 0.24664073, %v347_v42  ;;  %v359_v13 = vmul.f32 %v899_v60, %v351_v47  ;;  %v360_v17 = vmul.f32 %v905_v0, %v352_v49  ;;  %v361_v39 = vmul.f32 %v911_v6, %v353_v50 }
  0x80   :  { %v356_v62 = vadd.f32 0.24664073, %v348_v43  ;;  %v378_v18 = vand.u32 2147483648, %v881_v45  ;;  %v362_v20 = vmul.f32 %v917_v15, %v354_v53  ;;  %v376_v21 = vsel %vm375_vm0, %v881_v45, %v374_v54 }
  0x81   :  { %vm377_vm1 = vcmp.eq.f32.partialorder %v881_v45, 0.0  ;;  %730 = vrsqrt.f32 %v885_v51  ;;  %v363_v52 = vmul.f32 %v921_v19, %v355_v57  ;;  %v1000_v56 = vstv %s681_s2 }
  0x82   :  { %732 = vrsqrt.f32 %v890_v55  ;;  %v1003_v60 = vstv %s978_s0  ;;  %v364_v0 = vmul.f32 %v926_v23, %v356_v62  ;;  %v1006_v6 = vadd.f32 1.5014094, %v357_v2 }
  0x83   :  { %734 = vrsqrt.f32 %v896_v59  ;;  %v629_v15 = vunpack.c.0.s8 %v985_v61  ;;  %v1010_v22 = vadd.f32 1.5014094, %v358_v7  ;;  %v1012_v24 = vadd.f32 1.5014094, %v359_v13 }
  0x84   :  { %v379_v25 = vsel %vm377_vm1, %v378_v18, %v376_v21  ;;  %736 = vrsqrt.f32 %v902_v63  ;;  %v1015_v19 = vadd.f32 1.5014094, %v360_v17  ;;  %v1017_v26 = vadd.f32 1.5014094, %v361_v39 }
  0x85   :  { %v1019_v27 = vadd.f32 1.5014094, %v362_v20  ;;  %738 = vrsqrt.f32 %v908_v3  ;;  %v1022_v23 = vadd.f32 1.5014094, %v363_v52  ;;  %vm382_vm2 = vcmp.eq.f32.partialorder %v883_v48, inf }
  0x86   :  { %vm384_vm3 = vcmp.eq.f32.partialorder %v883_v48, 0.0  ;;  %740 = vrsqrt.f32 %v914_v14  ;;  %v1027_v28 = vadd.f32 1.5014094, %v364_v0  ;;  %v385_v29 = vand.u32 2147483648, %v883_v48 }
  0x87   :  { %vm389_vm4 = vcmp.eq.f32.partialorder %v885_v51, inf  ;;  %v1031_v30 = vadd.f32 -3.0, %v379_v25  ;;  %vm391_vm5 = vcmp.eq.f32.partialorder %v885_v51, 0.0  ;;  %v392_v31 = vand.u32 2147483648, %v885_v51 }
  0x88   :  { %vm396_vm6 = vcmp.eq.f32.partialorder %v890_v55, inf  ;;  %vm398_vm7 = vcmp.eq.f32.partialorder %v890_v55, 0.0  ;;  %v729_v32 = vpop.eup %728  ;;  %v399_v33 = vand.u32 2147483648, %v890_v55  ;;  %vm403_vm8 = vcmp.eq.f32.partialorder %v896_v59, inf }
  0x89   :  { %vm405_vm9 = vcmp.eq.f32.partialorder %v896_v59, 0.0  ;;  %v437_v34 = vmul.f32 -0.00020021426, %v1031_v30  ;;  %v381_v35 = vmul.f32 %v729_v32, %v883_v48  ;;  %v406_v36 = vand.u32 2147483648, %v896_v59 }
  0x8a   :  { %vm410_vm10 = vcmp.eq.f32.partialorder %v902_v63, inf  ;;  %vm412_vm11 = vcmp.eq.f32.partialorder %v902_v63, 0.0  ;;  %v413_v38 = vand.u32 2147483648, %v902_v63  ;;  %vm417_vm12 = vcmp.eq.f32.partialorder %v908_v3, inf }
  0x8b   :  { %v731_v37 = vpop.eup %730  ;;  %vm419_vm13 = vcmp.eq.f32.partialorder %v908_v3, 0.0  ;;  %v445_v40 = vadd.f32 0.00010095056, %v437_v34  ;;  %v383_v42 = vsel %vm382_vm2, %v883_v48, %v381_v35  ;;  %v420_v44 = vand.u32 2147483648, %v908_v3 }
  0x8c   :  { %v733_v41 = vpop.eup %732  ;;  %v388_v43 = vmul.f32 %v731_v37, %v885_v51  ;;  %vm424_vm14 = vcmp.eq.f32.partialorder %v914_v14, inf  ;;  %v386_v47 = vsel %vm384_vm3, %v385_v29, %v383_v42  ;;  %vm426_vm15 = vcmp.eq.f32.partialorder %v914_v14, 0.0 }
  0x8d   :  { %v735_v46 = vpop.eup %734  ;;  %v395_v49 = vmul.f32 %v733_v41, %v890_v55  ;;  %v453_v50 = vmul.f32 %v1031_v30, %v445_v40  ;;  %v427_v58 = vand.u32 2147483648, %v914_v14  ;;  %v1064_v62 = vadd.f32 -3.0, %v386_v47 }
  0x8e   :  { %v737_v53 = vpop.eup %736  ;;  %v390_v54 = vsel %vm389_vm4, %v885_v51, %v388_v43  ;;  %v402_v57 = vmul.f32 %v735_v46, %v896_v59  ;;  %vm565_vm0 = vcmp.lt.f32.partialorder %v881_v45, 5.0  ;;  %vm566_vm1 = vcmp.lt.f32.partialorder %v883_v48, 5.0 }
  0x8f   :  { %v739_v2 = vpop.eup %738  ;;  %v393_v7 = vsel %vm391_vm5, %v392_v31, %v390_v54  ;;  %v397_v13 = vsel %vm396_vm6, %v890_v55, %v395_v49  ;;  %v409_v17 = vmul.f32 %v737_v53, %v902_v63  ;;  %v461_v39 = vadd.f32 0.0013493432, %v453_v50 }
  0x90   :  { %v741_v18 = vpop.eup %740  ;;  %v400_v20 = vsel %vm398_vm7, %v399_v33, %v397_v13  ;;  %v404_v21 = vsel %vm403_vm8, %v896_v59, %v402_v57  ;;  %v416_v52 = vmul.f32 %v739_v2, %v908_v3  ;;  %v1078_v0 = vadd.f32 -3.0, %v393_v7 }
  0x91   :  { %v407_v25 = vsel %vm405_vm9, %v406_v36, %v404_v21  ;;  %v411_v29 = vsel %vm410_vm10, %v902_v63, %v409_v17  ;;  %v423_v31 = vmul.f32 %v741_v18, %v914_v14  ;;  %v1086_v32 = vadd.f32 -3.0, %v400_v20 }
  0x92   :  { %v414_v33 = vsel %vm412_vm11, %v413_v38, %v411_v29  ;;  %v418_v34 = vsel %vm417_vm12, %v908_v3, %v416_v52  ;;  %v1093_v35 = vadd.f32 -3.0, %v407_v25  ;;  %v438_v37 = vmul.f32 -0.00020021426, %v1064_v62 }
  0x93   :  { %v421_v36 = vsel %vm419_vm13, %v420_v44, %v418_v34  ;;  %v425_v40 = vsel %vm424_vm14, %v914_v14, %v423_v31  ;;  %v1101_v41 = vadd.f32 -3.0, %v414_v33  ;;  %v439_v42 = vmul.f32 -0.00020021426, %v1078_v0 }
  0x94   :  { %v428_v38 = vsel %vm426_vm15, %v427_v58, %v425_v40  ;;  %v1106_v43 = vadd.f32 -3.0, %v421_v36  ;;  %v440_v46 = vmul.f32 -0.00020021426, %v1086_v32  ;;  %v441_v47 = vmul.f32 -0.00020021426, %v1093_v35 }
  0x95   :  { %v1110_v49 = vadd.f32 -3.0, %v428_v38  ;;  %v442_v44 = vmul.f32 -0.00020021426, %v1101_v41  ;;  %v446_v50 = vadd.f32 0.00010095056, %v438_v37  ;;  %v469_v53 = vmul.f32 %v1031_v30, %v461_v39 }
  0x96   :  { %v443_v54 = vmul.f32 -0.00020021426, %v1106_v43  ;;  %v447_v57 = vadd.f32 0.00010095056, %v439_v42  ;;  %v448_v2 = vadd.f32 0.00010095056, %v440_v46  ;;  %v1118_v58 = vsub.s32 %v629_v15, %v843_v1 }
  0x97   :  { %v444_v7 = vmul.f32 -0.00020021426, %v1110_v49  ;;  %v449_v13 = vadd.f32 0.00010095056, %v441_v47  ;;  %v450_v17 = vadd.f32 0.00010095056, %v442_v44  ;;  %v454_v18 = vmul.f32 %v1064_v62, %v446_v50 }
  0x98   :  { %v451_v20 = vadd.f32 0.00010095056, %v443_v54  ;;  %v455_v21 = vmul.f32 %v1078_v0, %v447_v57  ;;  %v456_v39 = vmul.f32 %v1086_v32, %v448_v2  ;;  %v477_v52 = vadd.f32 -0.0036734284, %v469_v53 }
  0x99   :  { %v452_v25 = vadd.f32 0.00010095056, %v444_v7  ;;  %v457_v29 = vmul.f32 %v1093_v35, %v449_v13  ;;  %v458_v31 = vmul.f32 %v1101_v41, %v450_v17  ;;  %v462_v61 = vadd.f32 0.0013493432, %v454_v18 }
  0x9a   :  { %v459_v1 = vmul.f32 %v1106_v43, %v451_v20  ;;  %v463_v15 = vadd.f32 0.0013493432, %v455_v21  ;;  %v464_v33 = vadd.f32 0.0013493432, %v456_v39  ;;  %v485_v34 = vmul.f32 %v1031_v30, %v477_v52 }
  0x9b   :  { %v460_v37 = vmul.f32 %v1110_v49, %v452_v25  ;;  %v465_v36 = vadd.f32 0.0013493432, %v457_v29  ;;  %v466_v40 = vadd.f32 0.0013493432, %v458_v31  ;;  %v470_v42 = vmul.f32 %v1064_v62, %v462_v61 }
  0x9c   :  { %v467_v38 = vadd.f32 0.0013493432, %v459_v1  ;;  %v471_v46 = vmul.f32 %v1078_v0, %v463_v15  ;;  %v472_v47 = vmul.f32 %v1086_v32, %v464_v33  ;;  %v493_v44 = vadd.f32 0.0057395077, %v485_v34 }
  0x9d   :  { %v468_v50 = vadd.f32 0.0013493432, %v460_v37  ;;  %v473_v53 = vmul.f32 %v1093_v35, %v465_v36  ;;  %v474_v54 = vmul.f32 %v1101_v41, %v466_v40  ;;  %v478_v57 = vadd.f32 -0.0036734284, %v470_v42 }
  0x9e   :  { %v475_v2 = vmul.f32 %v1106_v43, %v467_v38  ;;  %v479_v7 = vadd.f32 -0.0036734284, %v471_v46  ;;  %v480_v13 = vadd.f32 -0.0036734284, %v472_v47  ;;  %v501_v17 = vmul.f32 %v1031_v30, %v493_v44 }
  0x9f   :  { %v476_v18 = vmul.f32 %v1110_v49, %v468_v50  ;;  %v481_v20 = vadd.f32 -0.0036734284, %v473_v53  ;;  %v482_v21 = vadd.f32 -0.0036734284, %v474_v54  ;;  %v486_v39 = vmul.f32 %v1064_v62, %v478_v57 }
  0xa0   :  { %v483_v52 = vadd.f32 -0.0036734284, %v475_v2  ;;  %v487_v25 = vmul.f32 %v1078_v0, %v479_v7  ;;  %v488_v29 = vmul.f32 %v1086_v32, %v480_v13  ;;  %v509_v31 = vadd.f32 -0.0076224613, %v501_v17 }
  0xa1   :  { %v484_v61 = vadd.f32 -0.0036734284, %v476_v18  ;;  %v489_v1 = vmul.f32 %v1093_v35, %v481_v20  ;;  %v490_v15 = vmul.f32 %v1101_v41, %v482_v21  ;;  %v494_v33 = vadd.f32 0.0057395077, %v486_v39 }
  0xa2   :  { %v491_v34 = vmul.f32 %v1106_v43, %v483_v52  ;;  %v495_v37 = vadd.f32 0.0057395077, %v487_v25  ;;  %v496_v36 = vadd.f32 0.0057395077, %v488_v29  ;;  %v517_v40 = vmul.f32 %v1031_v30, %v509_v31 }
  0xa3   :  { %v492_v42 = vmul.f32 %v1110_v49, %v484_v61  ;;  %v497_v38 = vadd.f32 0.0057395077, %v489_v1  ;;  %v498_v46 = vadd.f32 0.0057395077, %v490_v15  ;;  %v502_v47 = vmul.f32 %v1064_v62, %v494_v33 }
  0xa4   :  { %v499_v44 = vadd.f32 0.0057395077, %v491_v34  ;;  %v503_v50 = vmul.f32 %v1078_v0, %v495_v37  ;;  %v504_v53 = vmul.f32 %v1086_v32, %v496_v36  ;;  %v525_v54 = vadd.f32 0.0094388705, %v517_v40 }
  0xa5   :  { %v500_v57 = vadd.f32 0.0057395077, %v492_v42  ;;  %v505_v2 = vmul.f32 %v1093_v35, %v497_v38  ;;  %v506_v7 = vmul.f32 %v1101_v41, %v498_v46  ;;  %v510_v13 = vadd.f32 -0.0076224613, %v502_v47 }
  0xa6   :  { %v507_v17 = vmul.f32 %v1106_v43, %v499_v44  ;;  %v511_v18 = vadd.f32 -0.0076224613, %v503_v50  ;;  %v512_v20 = vadd.f32 -0.0076224613, %v504_v53  ;;  %v533_v21 = vmul.f32 %v1031_v30, %v525_v54 }
  0xa7   :  { %v508_v39 = vmul.f32 %v1110_v49, %v500_v57  ;;  %v513_v52 = vadd.f32 -0.0076224613, %v505_v2  ;;  %v514_v25 = vadd.f32 -0.0076224613, %v506_v7  ;;  %v518_v29 = vmul.f32 %v1064_v62, %v510_v13 }
  0xa8   :  { %v515_v31 = vadd.f32 -0.0076224613, %v507_v17  ;;  %v519_v61 = vmul.f32 %v1078_v0, %v511_v18  ;;  %v520_v1 = vmul.f32 %v1086_v32, %v512_v20  ;;  %v541_v15 = vadd.f32 1.001674, %v533_v21 }
  0xa9   :  { %v516_v33 = vadd.f32 -0.0076224613, %v508_v39  ;;  %v521_v34 = vmul.f32 %v1093_v35, %v513_v52  ;;  %v522_v37 = vmul.f32 %v1101_v41, %v514_v25  ;;  %v526_v36 = vadd.f32 0.0094388705, %v518_v29 }
  0xaa   :  { %vm567_vm2 = vcmp.lt.f32.partialorder %v885_v51, 5.0  ;;  %vm568_vm3 = vcmp.lt.f32.partialorder %v890_v55, 5.0  ;;  %v523_v40 = vmul.f32 %v1106_v43, %v515_v31  ;;  %v527_v42 = vadd.f32 0.0094388705, %v519_v61 }
  0xab   :  { %v528_v38 = vadd.f32 0.0094388705, %v520_v1  ;;  %v549_v46 = vmul.f32 %v1031_v30, %v541_v15  ;;  %vm569_vm4 = vcmp.lt.f32.partialorder %v896_v59, 5.0  ;;  %vm570_vm5 = vcmp.lt.f32.partialorder %v902_v63, 5.0 }
  0xac   :  { %v524_v47 = vmul.f32 %v1110_v49, %v516_v33  ;;  %v529_v44 = vadd.f32 0.0094388705, %v521_v34  ;;  %v530_v50 = vadd.f32 0.0094388705, %v522_v37  ;;  %v534_v53 = vmul.f32 %v1064_v62, %v526_v36 }
  0xad   :  { %vm571_vm6 = vcmp.lt.f32.partialorder %v908_v3, 5.0  ;;  %v531_v54 = vadd.f32 0.0094388705, %v523_v40  ;;  %v535_v57 = vmul.f32 %v1078_v0, %v527_v42  ;;  %v536_v2 = vmul.f32 %v1086_v32, %v528_v38 }
  0xae   :  { %v557_v7 = vadd.f32 2.8329768, %v549_v46  ;;  %vm572_vm7 = vcmp.lt.f32.partialorder %v914_v14, 5.0  ;;  %v532_v30 = vadd.f32 0.0094388705, %v524_v47  ;;  %v537_v13 = vmul.f32 %v1093_v35, %v529_v44 }
  0xaf   :  { %v538_v17 = vmul.f32 %v1101_v41, %v530_v50  ;;  %v542_v18 = vadd.f32 1.001674, %v534_v53  ;;  %v539_v20 = vmul.f32 %v1106_v43, %v531_v54  ;;  %v543_v21 = vadd.f32 1.001674, %v535_v57 }
  0xb0   :  { %v544_v39 = vadd.f32 1.001674, %v536_v2  ;;  %v573_v52 = vsel %vm565_vm0, %v1006_v6, %v557_v7  ;;  %v540_v25 = vmul.f32 %v1110_v49, %v532_v30  ;;  %v545_v29 = vadd.f32 1.001674, %v537_v13 }
  0xb1   :  { %v546_v31 = vadd.f32 1.001674, %v538_v17  ;;  %v550_v61 = vmul.f32 %v1064_v62, %v542_v18  ;;  %v547_v1 = vadd.f32 1.001674, %v539_v20  ;;  %v551_v15 = vmul.f32 %v1078_v0, %v543_v21 }
  0xb2   :  { %v552_v33 = vmul.f32 %v1086_v32, %v544_v39  ;;  %v581_v34 = vmul.f32 %v849_v4, %v573_v52  ;;  %v548_v37 = vadd.f32 1.001674, %v540_v25  ;;  %v553_v36 = vmul.f32 %v1093_v35, %v545_v29 }
  0xb3   :  { %v554_v40 = vmul.f32 %v1101_v41, %v546_v31  ;;  %v558_v45 = vadd.f32 2.8329768, %v550_v61  ;;  %v555_v6 = vmul.f32 %v1106_v43, %v547_v1  ;;  %v559_v42 = vadd.f32 2.8329768, %v551_v15  ;;  %v615_v61 = vld [vmem:[#allocation7] sm:$0xff] }
  0xb4   :  { %v560_v38 = vadd.f32 2.8329768, %v552_v33  ;;  %v589_v46 = vmul.f32 1.4142135, %v581_v34  ;;  %v556_v62 = vmul.f32 %v1110_v49, %v548_v37  ;;  %v561_v47 = vadd.f32 2.8329768, %v553_v36 }
  0xb5   :  { %v562_v44 = vadd.f32 2.8329768, %v554_v40  ;;  %v574_v0 = vsel %vm566_vm1, %v1010_v22, %v558_v45  ;;  %v563_v4 = vadd.f32 2.8329768, %v555_v6  ;;  %v575_v32 = vsel %vm567_vm2, %v1012_v24, %v559_v42  ;;  %v616_v33 = vld [vmem:[#allocation7 + $0x8] sm:$0xff] }
  0xb6   :  { %v576_v35 = vsel %vm568_vm3, %v1015_v19, %v560_v38  ;;  %v582_v41 = vmul.f32 %v851_v5, %v574_v0  ;;  %v564_v43 = vadd.f32 2.8329768, %v556_v62  ;;  %v577_v49 = vsel %vm569_vm4, %v1017_v26, %v561_v47 }
  0xb7   :  { %v578_v48 = vsel %vm570_vm5, %v1019_v27, %v562_v44  ;;  %v583_v22 = vmul.f32 %v853_v8, %v575_v32  ;;  %v579_v51 = vsel %vm571_vm6, %v1022_v23, %v563_v4  ;;  %v584_v55 = vmul.f32 %v855_v9, %v576_v35 }
  0xb8   :  { %v585_v24 = vmul.f32 %v857_v10, %v577_v49  ;;  %v586_v5 = vmul.f32 %v859_v11, %v578_v48  ;;  %v580_v59 = vsel %vm572_vm7, %v1027_v28, %v564_v43  ;;  %v587_v19 = vmul.f32 %v861_v12, %v579_v51 }
  0xb9   :  { %v590_v63 = vmul.f32 1.4142135, %v582_v41  ;;  %v591_v26 = vmul.f32 1.4142135, %v583_v22  ;;  %v588_v8 = vmul.f32 %v866_v16, %v580_v59  ;;  %v592_v27 = vmul.f32 1.4142135, %v584_v55 }
  0xba   :  { %v593_v50 = vmul.f32 1.4142135, %v585_v24  ;;  %v594_v3 = vmul.f32 1.4142135, %v586_v5  ;;  %v595_v23 = vmul.f32 1.4142135, %v587_v19  ;;  %v598_v9 = vmul.f32 %v1000_v56, %v589_v46 }
  0xbb   :  { %v599_v10 = vmul.f32 %v1000_v56, %v590_v63  ;;  %v600_v11 = vmul.f32 %v1000_v56, %v591_v26  ;;  %v596_v53 = vmul.f32 1.4142135, %v588_v8  ;;  %v601_v14 = vmul.f32 %v1000_v56, %v592_v27 }
  0xbc   :  { %v602_v28 = vmul.f32 %v1000_v56, %v593_v50  ;;  %v603_v12 = vmul.f32 %v1000_v56, %v594_v3  ;;  %v604_v54 = vmul.f32 %v1000_v56, %v595_v23  ;;  %v607_v16 = vadd.f32 %v1003_v60, %v598_v9 }
  0xbd   :  { %v608_v57 = vadd.f32 %v1003_v60, %v599_v10  ;;  %v609_v2 = vadd.f32 %v1003_v60, %v600_v11  ;;  %v605_v7 = vmul.f32 %v1000_v56, %v596_v53  ;;  %v610_v30 = vadd.f32 %v1003_v60, %v601_v14 }
  0xbe   :  { %v611_v13 = vadd.f32 %v1003_v60, %v602_v28  ;;  %v612_v17 = vadd.f32 %v1003_v60, %v603_v12  ;;  %v613_v18 = vadd.f32 %v1003_v60, %v604_v54 }
  0xbf   :  { %v625_v20 = vcombine.low %v607_v16, %v608_v57  ;;  %v614_v21 = vadd.f32 %v1003_v60, %v605_v7  ;;  %v626_v39 = vcombine.low %v609_v2, %v610_v30 }
  0xc0   :  { %v642_v52 = vcombine.low %v611_v13, %v612_v17 }
  0xc1   :  { %v633_v25 = vrot.slane %v625_v20, %v1118_v58  ;;  %v640_v29 = vrot.slane %v626_v39, %v1118_v58  ;;  %v643_v31 = vcombine.low %v613_v18, %v614_v21 }
  0xc2   :  { %v650_v56 = vrot.slane %v642_v52, %v1118_v58 }
  0xc3   :  { %v641_v1 = vcombine.low %v633_v25, %v640_v29  ;;  %v657_v15 = vrot.slane %v643_v31, %v1118_v58 }
  0xc5   :  { %v658_v34 = vcombine.low %v650_v56, %v657_v15  ;;  %v661_v37 = vadd.f32 %v641_v1, %v615_v61 }
  0xc7   :  { %v662_v36 = vadd.f32 %v658_v34, %v616_v33  ;;  %663 = vst [vmem:[#allocation8] sm:$0xff] %v661_v37 }
  0xc9   :  { %664 = vst [vmem:[#allocation8 + $0x8] sm:$0xff] %v662_v36 }
  0xca   :  { %787 = shalt.err (!%p784_p3)
}
  0xcb   :  { %s788_s9 = scalar_lea.hbm %s1250_s3, 256 }
  0xcc   :  { %p789_p4 = scmp.ne.s32.totalorder %s1250_s3, %s788_s9  ;;  %p792_p5 = scmp.lt.u32.totalorder %s788_s9, %s1250_s3 }
  0xce   :  { %p794_p6 = pnand %p792_p5, %p789_p4 }
  0xd0   :  { %797 = shalt.err (!%p794_p6)
}
  0xd1   :  { %674 = dma.vmem_to_hbm [thread:$0]  %s672_s5, 256, %s1250_s3, [#allocation5]  }
  0xd2   :  { %802 = dma.done.wait [#allocation5], 256  }
  0xd3   :  { %803 = vsyncadd [#allocation5], 4294967040 }
  0xd4   :  { %678 = vsyncpa [#allocation4], 1 }
  0xd5   :  { %679 = vsyncpa [#allocation5], 1 }
  0xd6   :  { %680 = vsyncpa [#allocation6], 1 }

</bundles_post_ra>
